<compile_context>
chip_gen: v7x
topology: tpu7x:2x2x1
jax: 0.10.0
libtpu: 0.0.40
codegen_flags: <defaults>
</compile_context>

<pallas_src>
import jax
import jax.numpy as jnp
from jax.experimental import pallas as pl
from jax.experimental.pallas import tpu as pltpu


def wsd_head_kernel(seq_ref, w_att_ref, w_cls_ref, b_cls_ref, out_ref):
    """One batch tile of attention-pooled classification.

    seq_ref:   [TB, S, H]     f32 or bf16  (roberta last_hidden_state tile)
    w_att_ref: [1, H]         f32          (attention Linear weight, row layout)
    w_cls_ref: [H, Npad]      f32          (classifier weight, N padded to 128x)
    b_cls_ref: [1, Npad]      f32
    out_ref:   [TB, 1, Npad]  f32          (logits tile)
    """
    seq = seq_ref[...]                                    # [TB, S, H]
    tb, s, h = seq.shape
    cdt = seq.dtype

    # Attention scores, lane-dense over S: [TB, 1, S].
    # (b_att is intentionally omitted — a constant added to every score along
    #  the softmax axis cancels exactly in the softmax.)
    w_att = jnp.broadcast_to(w_att_ref[...].astype(cdt), (tb, 1, h))
    scores = jnp.einsum("bqh,bsh->bqs", w_att, seq,
                        preferred_element_type=jnp.float32)        # [TB,1,S]

    # Numerically stable softmax over the sequence (lane) axis.
    m = jnp.max(scores, axis=-1, keepdims=True)                    # [TB,1,1]
    e = jnp.exp(scores - m)                                        # [TB,1,S]
    denom = jnp.sum(e, axis=-1, keepdims=True)                     # [TB,1,1]

    # Attention-weighted pooling on the MXU: [TB,1,S] x [TB,S,H] -> [TB,1,H].
    agg = jnp.einsum("bqs,bsh->bqh", e.astype(cdt), seq,
                     preferred_element_type=jnp.float32)
    agg = agg * pl.reciprocal(denom, approx=True)                  # normalize
    agg2 = agg.reshape(tb, h)                                      # drop q=1

    # Classifier: [TB, H] @ [H, Npad] + bias -> lane-dense logits.
    logits = jnp.dot(agg2, w_cls_ref[...],
                     preferred_element_type=jnp.float32) + b_cls_ref[...]
    out_ref[:, 0, :] = logits.astype(out_ref.dtype)


def wsd_head(seq_output, w_att, b_att, w_cls, b_cls, *, batch_tile=None):
    """seq_output: [B, S, H] (f32 or bf16); returns logits [B, num_senses] f32.

    w_att: [H, 1], b_att: [1, 1] (cancels in softmax -> unused),
    w_cls: [H, N], b_cls: [1, N].
    """
    del b_att  # constant shift along the softmax axis — mathematically a no-op
    B, S, H = seq_output.shape
    N = w_cls.shape[1]
    Npad = ((N + 127) // 128) * 128

    # Host-side parameter plumbing (outside the kernel, negligible cost).
    w_att_row = jnp.asarray(w_att, jnp.float32).reshape(1, H)
    w_cls_p = jnp.asarray(w_cls, jnp.float32)
    b_cls_p = jnp.asarray(b_cls, jnp.float32).reshape(1, N)
    if Npad != N:
        w_cls_p = jnp.pad(w_cls_p, ((0, 0), (0, Npad - N)))
        b_cls_p = jnp.pad(b_cls_p, ((0, 0), (0, Npad - N)))

    itemsize = jnp.dtype(seq_output.dtype).itemsize

    # Batch tile: largest divisor of B whose double-buffered seq tile fits a
    # conservative budget (safe on v7x's 64 MiB VMEM as well as v5e/v6e).
    if batch_tile is None:
        budget = 16 * 1024 * 1024
        tb = max(1, min(B, budget // max(1, 2 * S * H * itemsize)))
    else:
        tb = max(1, min(int(batch_tile), B))
    while B % tb:
        tb -= 1
    grid = (B // tb,)

    seq_tile_bytes = 2 * tb * S * H * itemsize        # double-buffered input
    param_bytes = (H + H * Npad + Npad) * 4           # resident weights
    out_bytes = 2 * tb * Npad * 4                     # double-buffered output
    scratch_bytes = 8 * tb * max(S, H) * 4            # softmax / agg temporaries
    needed = seq_tile_bytes + param_bytes + out_bytes + scratch_bytes
    vmem_limit = int(min(max(2 * needed, 32 * 1024 * 1024), 100 * 1024 * 1024))

    cost = pl.CostEstimate(
        flops=int(4 * B * S * H + 2 * B * H * Npad),
        transcendentals=int(B * S),
        bytes_accessed=int(B * S * H * itemsize + param_bytes + B * Npad * 4),
    )

    out = pl.pallas_call(
        wsd_head_kernel,
        out_shape=jax.ShapeDtypeStruct((B, 1, Npad), jnp.float32),
        grid=grid,
        in_specs=[
            pl.BlockSpec((tb, S, H), lambda b: (b, 0, 0)),   # seq (batch-tiled)
            pl.BlockSpec((1, H), lambda b: (0, 0)),          # w_att (resident)
            pl.BlockSpec((H, Npad), lambda b: (0, 0)),       # w_cls (resident)
            pl.BlockSpec((1, Npad), lambda b: (0, 0)),       # b_cls (resident)
        ],
        out_specs=pl.BlockSpec((tb, 1, Npad), lambda b: (b, 0, 0)),
        compiler_params=pltpu.CompilerParams(
            dimension_semantics=("parallel",),
            vmem_limit_bytes=vmem_limit,
        ),
        cost_estimate=cost,
    )(seq_output, w_att_row, w_cls_p, b_cls_p)

    return out[:, 0, :N]


def reference_head(seq_output, w_att, b_att, w_cls, b_cls):
    """Pure-JAX reference matching the PyTorch forward semantics (incl. b_att)."""
    scores = jnp.einsum("bsh,ho->bso", seq_output, w_att) + b_att[None, :, :]
    attn = jax.nn.softmax(scores, axis=1)
    agg = jnp.sum(seq_output * attn, axis=1)
    return agg @ w_cls + b_cls


if __name__ == "__main__":
    # Small shapes consistent with the module's forward.
    B, S, H = 2, 8, 32          # batch, seq_len, hidden_size
    NUM_SENSES = 16
    VOCAB = 64

    key = jax.random.PRNGKey(0)
    k_ids, k_emb, k_wa, k_ba, k_wc, k_bc = jax.random.split(key, 6)

    # Module inputs: input_ids / attention_mask (as in the PyTorch forward).
    input_ids = jax.random.randint(k_ids, (B, S), 0, VOCAB, dtype=jnp.int32)
    attention_mask = jnp.ones((B, S), dtype=jnp.int32)

    # Deterministic stub for the roberta backbone (embedding lookup, masked).
    # TODO(synk): full transformer encoder not implemented in Pallas.
    emb_table = jax.random.normal(k_emb, (VOCAB, H), dtype=jnp.float32) * 0.1
    seq_output = emb_table[input_ids] * attention_mask[..., None].astype(jnp.float32)

    # Deterministic parameter init (shapes from __init__; stored as [H, out]).
    w_att = jax.random.normal(k_wa, (H, 1), dtype=jnp.float32) * 0.05
    b_att = jax.random.normal(k_ba, (1, 1), dtype=jnp.float32) * 0.05
    w_cls = jax.random.normal(k_wc, (H, NUM_SENSES), dtype=jnp.float32) * 0.05
    b_cls = jax.random.normal(k_bc, (1, NUM_SENSES), dtype=jnp.float32) * 0.05

    ref = reference_head(seq_output, w_att, b_att, w_cls, b_cls)

    # f32 path; batch_tile=1 so the grid has >1 step and pipelining is exercised.
    logits = jax.block_until_ready(
        wsd_head(seq_output, w_att, b_att, w_cls, b_cls, batch_tile=1))
    assert logits.shape == (B, NUM_SENSES)
    assert jnp.allclose(logits, ref, atol=1e-3, rtol=1e-3), (
        f"max abs diff {jnp.max(jnp.abs(logits - ref))}")

    # bf16 activation path (halves HBM traffic at real shapes); f32 accumulation.
    logits_bf16 = jax.block_until_ready(
        wsd_head(seq_output.astype(jnp.bfloat16), w_att, b_att, w_cls, b_cls))
    assert jnp.allclose(logits_bf16, ref, atol=2e-2, rtol=2e-2), (
        f"max abs diff (bf16) {jnp.max(jnp.abs(logits_bf16 - ref))}")

    print("KERNEL_OK")
</pallas_src>

<mosaic_0001>
module attributes {stable_mosaic.version = 11 : i64} {
  func.func @wsd_head_kernel(%arg0: i32, %arg1: memref<1x8x32xf32, #tpu.memory_space<vmem>>, %arg2: memref<1x32xf32, #tpu.memory_space<vmem>>, %arg3: memref<32x128xf32, #tpu.memory_space<vmem>>, %arg4: memref<1x128xf32, #tpu.memory_space<vmem>>, %arg5: memref<1x1x128xf32, #tpu.memory_space<vmem>>) attributes {dimension_semantics = [#tpu.dimension_semantics<parallel>], iteration_bounds = array<i64: 2>, scalar_prefetch = 0 : i64, scratch_operands = 0 : i64, tpu.core_type = #tpu.core_type<tc>, window_params = [{transform_indices = @transform_0, window_bounds = array<i64: 1, 8, 32>}, {pipeline_mode = #tpu.pipeline_mode<synchronous>, transform_indices = @transform_1, window_bounds = array<i64: 1, 32>}, {pipeline_mode = #tpu.pipeline_mode<synchronous>, transform_indices = @transform_2, window_bounds = array<i64: 32, 128>}, {pipeline_mode = #tpu.pipeline_mode<synchronous>, transform_indices = @transform_3, window_bounds = array<i64: 1, 128>}, {transform_indices = @transform_4, window_bounds = array<i64: 1, 1, 128>}]} {
    %c0 = arith.constant 0 : index
    %c0_0 = arith.constant 0 : index
    %c0_1 = arith.constant 0 : index
    %0 = vector.load %arg1[%c0, %c0_0, %c0_1] : memref<1x8x32xf32, #tpu.memory_space<vmem>>, vector<1x8x32xf32>
    %c0_2 = arith.constant 0 : index
    %c0_3 = arith.constant 0 : index
    %1 = vector.load %arg2[%c0_2, %c0_3] : memref<1x32xf32, #tpu.memory_space<vmem>>, vector<1x32xf32>
    %2 = vector.shape_cast %1 : vector<1x32xf32> to vector<1x1x32xf32>
    "tpu.trace_start"() <{level = 10 : i32, message = "bqh,bsh->bqs"}> : () -> ()
    %cst = arith.constant dense<0.000000e+00> : vector<1x1x8xf32>
    %3 = tpu.matmul %2, %0, %cst {dimension_numbers = #tpu.dot_dimension_numbers<[2], [2], [1], [1], [0, 0, 0, 1, 1, 1], [0], [0]>} : vector<1x1x32xf32>, vector<1x8x32xf32>, vector<1x1x8xf32> -> vector<1x1x8xf32>
    "tpu.trace_stop"() : () -> ()
    %cst_4 = arith.constant dense<0xFF800000> : vector<1x1xf32>
    %4 = vector.multi_reduction <maximumf>, %3, %cst_4 [2] : vector<1x1x8xf32> to vector<1x1xf32>
    %5 = vector.shape_cast %4 : vector<1x1xf32> to vector<1x1x1xf32>
    %6 = vector.broadcast %5 : vector<1x1x1xf32> to vector<1x1x8xf32>
    %7 = arith.subf %3, %6 : vector<1x1x8xf32>
    %8 = math.exp %7 : vector<1x1x8xf32>
    %cst_5 = arith.constant dense<0.000000e+00> : vector<1x1xf32>
    %9 = vector.multi_reduction <add>, %8, %cst_5 [2] : vector<1x1x8xf32> to vector<1x1xf32>
    %10 = vector.shape_cast %9 : vector<1x1xf32> to vector<1x1x1xf32>
    "tpu.trace_start"() <{level = 10 : i32, message = "bqs,bsh->bqh"}> : () -> ()
    %cst_6 = arith.constant dense<0.000000e+00> : vector<1x1x32xf32>
    %11 = tpu.matmul %8, %0, %cst_6 {dimension_numbers = #tpu.dot_dimension_numbers<[2], [1], [1], [2], [0, 0, 0, 1, 1, 2], [0], [0]>} : vector<1x1x8xf32>, vector<1x8x32xf32>, vector<1x1x32xf32> -> vector<1x1x32xf32>
    "tpu.trace_stop"() : () -> ()
    %12 = tpu.reciprocal %10 {approx = true} : vector<1x1x1xf32> -> vector<1x1x1xf32>
    %13 = vector.broadcast %12 : vector<1x1x1xf32> to vector<1x1x32xf32>
    %14 = arith.mulf %11, %13 : vector<1x1x32xf32>
    %15 = vector.shape_cast %14 : vector<1x1x32xf32> to vector<1x32xf32>
    %c0_7 = arith.constant 0 : index
    %c0_8 = arith.constant 0 : index
    %16 = vector.load %arg3[%c0_7, %c0_8] : memref<32x128xf32, #tpu.memory_space<vmem>>, vector<32x128xf32>
    %cst_9 = arith.constant dense<0.000000e+00> : vector<1x128xf32>
    %17 = tpu.matmul %15, %16, %cst_9 {dimension_numbers = #tpu.dot_dimension_numbers<[1], [0], [0], [1], [0, 0, 1, 1], [], []>} : vector<1x32xf32>, vector<32x128xf32>, vector<1x128xf32> -> vector<1x128xf32>
    %c0_10 = arith.constant 0 : index
    %c0_11 = arith.constant 0 : index
    %18 = vector.load %arg4[%c0_10, %c0_11] : memref<1x128xf32, #tpu.memory_space<vmem>>, vector<1x128xf32>
    %19 = arith.addf %17, %18 : vector<1x128xf32>
    %c0_12 = arith.constant 0 : index
    %c0_13 = arith.constant 0 : index
    %c0_14 = arith.constant 0 : index
    %20 = vector.load %arg5[%c0_12, %c0_13, %c0_14] : memref<1x1x128xf32, #tpu.memory_space<vmem>>, vector<1x1x128xf32>
    %21 = vector.shape_cast %20 : vector<1x1x128xf32> to vector<1x128xf32>
    %22 = vector.shape_cast %19 : vector<1x128xf32> to vector<1x1x128xf32>
    tpu.vector_store %arg5[%c0_12, %c0_13, %c0_14], %22 {strides = array<i32>} : memref<1x1x128xf32, #tpu.memory_space<vmem>>, vector<1x1x128xf32>,
    return
  }
  func.func @transform_0(%arg0: i32) -> (i32, i32, i32) {
    %c0_i32 = arith.constant 0 : i32
    %c0_i32_0 = arith.constant 0 : i32
    %c0_i32_1 = arith.constant 0 : i32
    return %arg0, %c0_i32, %c0_i32_0 : i32, i32, i32
  }
  func.func @transform_1(%arg0: i32) -> (i32, i32) {
    %c0_i32 = arith.constant 0 : i32
    %c0_i32_0 = arith.constant 0 : i32
    %c0_i32_1 = arith.constant 0 : i32
    return %c0_i32, %c0_i32_0 : i32, i32
  }
  func.func @transform_2(%arg0: i32) -> (i32, i32) {
    %c0_i32 = arith.constant 0 : i32
    %c0_i32_0 = arith.constant 0 : i32
    %c0_i32_1 = arith.constant 0 : i32
    return %c0_i32, %c0_i32_0 : i32, i32
  }
  func.func @transform_3(%arg0: i32) -> (i32, i32) {
    %c0_i32 = arith.constant 0 : i32
    %c0_i32_0 = arith.constant 0 : i32
    %c0_i32_1 = arith.constant 0 : i32
    return %c0_i32, %c0_i32_0 : i32, i32
  }
  func.func @transform_4(%arg0: i32) -> (i32, i32, i32) {
    %c0_i32 = arith.constant 0 : i32
    %c0_i32_0 = arith.constant 0 : i32
    %c0_i32_1 = arith.constant 0 : i32
    return %arg0, %c0_i32, %c0_i32_0 : i32, i32, i32
  }
}

</mosaic_0001>

<bundles_post_ra>
// kernel: tpu_custom_call.1
= control target key start
LH: loop header
LB: loop body
LE: loop exit
PB: predicated region body
PF: predicated region fallthrough
CT: control target
= control target key end

     0   :  { %9 = vsyncpa [#allocation3], 0  ;;  %s1047_s0 = inlined_call_operand.hbm [shape: f32[2,8,32], index: 0, kind: input, shape index: {}]   ;;  %s1048_s1 = inlined_call_operand.vmem [shape: f32[1,32], index: 1, kind: input, shape index: {}]   ;;  %s1049_s2 = inlined_call_operand.hbm [shape: f32[32,128], index: 2, kind: input, shape index: {}]   ;;  %s1050_s3 = inlined_call_operand.vmem [shape: f32[1,128], index: 3, kind: input, shape index: {}]   ;;  %s1051_s4 = inlined_call_operand.hbm [shape: f32[2,1,128], index: 4, kind: output, shape index: {}]  }
   0x1   :  { %11 = vsyncpa [#allocation3 + $0x1], 0 }
   0x2   :  { %12 = vsyncpa [#allocation6], 0 }
   0x3   :  { %13 = vsyncpa [#allocation4], 0 }
   0x4   :  { %15 = vsyncpa [#allocation4 + $0x1], 0  ;;  %s841_s15 = smov 0   ;;  %s843_s16 = smov 0  }
   0x5   :  { %s845_s17 = smov 0   ;;  %s847_s18 = smov 0  }
   0x6 LB: > { %s862_s19 = sadd.s32 4294967295, %s806_s18   ;;  %s560_s20 = sadd.s32 4294967294, %s806_s18   ;;  %s806_s18 = sphi %s847_s18, %s1071_s18   ;;  %s802_s17 = sphi %s845_s17, %s1070_s17   ;;  %s798_s16 = sphi %s843_s16, %s1069_s16   ;;  %s794_s15 = sphi %s841_s15, %s1068_s15  }
   0x7   : > { %p41_p0 = scmp.ne.s32.totalorder %s798_s16, %s794_s15  ;;  %p1052_p1 = scmp.eq.s32.totalorder %s862_s19, 0 }
   0x8   : > { %p134_p3 = scmp.eq.s32.totalorder %s560_s20, 1  ;;  %p561_p5 = scmp.ge.s32.totalorder %s806_s18, 1 }
   0x9   : > { %p871_p4 = por %p1052_p1, %p41_p0  ;;  %p141_p7 = scmp.lt.s32.totalorder %s806_s18, 3 }
   0xa   : > { %p876_p6 = por %p134_p3, %p41_p0  ;;  %s808_s24 = smov [#allocation5]  }
   0xb   : > { %s1055_s21 = scalar_select %p871_p4, 1, 0 }
   0xc   : > { %s1056_s22 = scalar_select %p876_p6, 1, 0 }
   0xd   : > { %p881_p8 = pnand %p561_p5, %p141_p7  ;;  %s156_s25 = sshll.u32 %s808_s24, 4  ;;  %s885_s25 = int_to_ptr.vmem [resolvable:$true] %s156_s25 }
   0xe   : > { %s897_s27 = sadd.s32 1, %s806_s18   ;;  %s28_s28 = sadd.s32 1, %s802_s17 }
   0xf   : > { %s1057_s23 = scalar_select %p881_p8, 1, 0 }
  0x10   : > { %p620_p9 = pneg %p881_p8  ;;  %s25_s29 = ssub.s32 %s806_s18, %s897_s27 }
  0x11   : > { %s678_s6 = scalar_lea.hbm %s1049_s2, 512 }
  0x12   : > { %p892_p11 = pnand %p620_p9, %p1052_p1  ;;  %p679_p12 = scmp.ne.s32.totalorder %s1049_s2, %s678_s6 }
  0x13   : > { %p685_p5 = scmp.lt.u32.totalorder %s678_s6, %s1049_s2 }
  0x14   : > { %p680_p13 = pneg %p892_p11 }
  0x16   : > { %p681_p0 = pnand %p680_p13, %p679_p12 }
  0x18   : > { %p682_p3 = pneg %p681_p0 }
  0x1a   : > { %p687_p7 = pnand %p685_p5, %p682_p3 }
  0x1c   : > { %690 = shalt.err (!%p687_p7)
}
  0x1d   : > { %s691_s11 = scalar_lea.vmem %s885_s25, 512  ;;  %p699_p2 = scmp.lt.s32.totalorder %s885_s25, %s885_s25 }
  0x1e   : > { %p692_p9 = scmp.ne.s32.totalorder %s885_s25, %s691_s11  ;;  %p700_p6 = scmp.lt.s32.totalorder %s691_s11, %s691_s11 }
  0x20   : > { %p694_p10 = pnand %p692_p9, %p680_p13  ;;  %p701_p4 = por %p700_p6, %p699_p2 }
  0x22   : > { %p695_p1 = pneg %p694_p10 }
  0x24   : > { %p702_p8 = pnand %p701_p4, %p695_p1 }
  0x26   : > { %705 = shalt.err (!%p702_p8)
}
  0x27   : > { %s809_s12 = smov 128   ;;  %s810_s13 = smov 8  }
  0x28   : > { %623 = dma.hbm_to_vmem [thread:$0]  (!%p892_p11), %s1049_s2, 512, %s885_s25, [#allocation6], %s809_s12, %s809_s12, %s810_s13  }
  0x29   : > { %p26_p2 = scmp.eq.s32.totalorder %s25_s29, 0  ;;  %p35_p1 = scmp.ne.s32.totalorder %s802_s17, %s798_s16 }
  0x2a   : > { %p36_p4 = scmp.eq.s32.totalorder %s806_s18, 0  ;;  %p633_p6 = scmp.lt.s32.totalorder %s806_s18, 2 }
  0x2b   : > { %s928_s24 = scalar_select %p26_p2, %s802_s17, %s28_s28  }
  0x2c   : > { %p37_p8 = por %p36_p4, %p35_p1  ;;  %p1059_p10 = scmp.eq.s32.totalorder %s862_s19, 1 }
  0x2d   : > { %s173_s5 = sand.u32 1, %s802_s17   ;;  %s565_s6 = sshll.u32 %s806_s18, 7 }
  0x2e   : > { %p932_p12 = por %p1059_p10, %p35_p1  ;;  %s564_s7 = sshll.u32 %s173_s5, 3 }
  0x2f   : > { %s941_s9 = scalar_lea.hbm %s1047_s0, %s565_s6  ;;  %s177_s25 = scalar_lea.vmem [#allocation2], %s564_s7 }
  0x30   : > { %s184_s28 = sshll.u32 %s177_s25, 4  ;;  %p943_p11 = pnand %p633_p6, %p37_p8  ;;  %s947_s28 = int_to_ptr.vmem [resolvable:$true] %s184_s28 }
  0x31   : > { %s174_s10 = scalar_lea.sflag [#allocation3], %s173_s5  ;;  %s706_s11 = scalar_lea.hbm %s941_s9, 128 }
  0x32   : > { %p707_p13 = scmp.ne.s32.totalorder %s941_s9, %s706_s11  ;;  %p708_p0 = pneg %p943_p11 }
  0x33   : > { %s711_s14 = scalar_lea.hbm %s1047_s0, 256  ;;  %p712_p7 = scmp.lt.u32.totalorder %s941_s9, %s1047_s0 }
  0x34   : > { %p709_p3 = pnand %p708_p0, %p707_p13  ;;  %p713_p9 = scmp.lt.u32.totalorder %s711_s14, %s706_s11 }
  0x35   : > { %p715_p1 = scmp.lt.u32.totalorder %s706_s11, %s941_s9 }
  0x36   : > { %p710_p5 = pneg %p709_p3  ;;  %p714_p2 = por %p713_p9, %p712_p7 }
  0x38   : > { %p716_p4 = por %p715_p1, %p714_p2 }
  0x3a   : > { %p717_p6 = pnand %p716_p4, %p710_p5 }
  0x3c   : > { %720 = shalt.err (!%p717_p6)
}
  0x3d   : > { %s721_s5 = scalar_lea.vmem %s947_s28, 128  ;;  %s811_s7 = smov [#allocation2]  }
  0x3e   : > { %p722_p8 = scmp.ne.s32.totalorder %s947_s28, %s721_s5  ;;  %s726_s26 = sshll.u32 %s811_s7, 4  ;;  %s727_s26 = int_to_ptr.vmem [resolvable:$false] %s726_s26 }
  0x3f   : > { %s728_s8 = scalar_lea.vmem %s727_s26, 256  ;;  %p729_p3 = scmp.lt.s32.totalorder %s947_s28, %s727_s26 }
  0x40   : > { %p724_p10 = pnand %p722_p8, %p708_p0  ;;  %p730_p7 = scmp.lt.s32.totalorder %s728_s8, %s721_s5 }
  0x42   : > { %p725_p13 = pneg %p724_p10  ;;  %p731_p9 = por %p730_p7, %p729_p3 }
  0x44   : > { %p732_p2 = pnand %p731_p9, %p725_p13 }
  0x46   : > { %735 = shalt.err (!%p732_p2)
}
  0x47   : > { %627 = dma.hbm_to_vmem [thread:$0]  (!%p943_p11), %s941_s9, 128, %s947_s28, %s174_s10  }
  0x48   : > { %p1062_p5 = scmp.ne.s32.totalorder %s1057_s23, 0 }
  0x49   : > { %s977_s25 = sand.u32 (!%p1062_p5), 1, %s798_s16   ;;  %p1063_p0 = scmp.ne.s32.totalorder (!%p1062_p5), %s1055_s21, 0 }
  0x4a   : > { %193 = sbr.rel (%p1062_p5) target bundleno = 902 (0x386), region = 36  ;;  %s567_s11 = sshll.u32 (!%p1062_p5), %s977_s25, 3 }
  0x4b   : > { %s196_s12 = scalar_lea.sflag (!%p1062_p5), [#allocation3], %s977_s25  ;;  %s199_s13 = scalar_lea.vmem (!%p1062_p5), [#allocation2], %s567_s11 }
  0x51   : > { %781 = dma.done.wait (%p1063_p0), %s196_s12, 128  }
  0x52   : > { %783 = vsyncadd (%p1063_p0), %s196_s12, 4294967168  ;;  %p1064_p1 = scmp.eq.s32.totalorder %s862_s19, 0 }
  0x54   : > { %785 = dma.done.wait (%p1064_p1), [#allocation6], 512   ;;  %p1065_p11 = pmov %p1064_p1 }
  0x55   : > { %v812_v0 = vmov 0.0   ;;  %vm813_vm0 = vmmov 0   ;;  %vm229_vm1 = vcmask 261120   ;;  %v227_v1 = vld [vmem:[%s199_s13] sm:$0xff]  ;;  %vm306_vm2 = vcmask 57344   ;;  %v392_v11 = vld [vmem:[#allocation5] sm:$0xff] }
  0x56   : > { %787 = vsyncadd (%p1065_p11), [#allocation6], 4294966784  ;;  %585 = vmatprep.subr.mxu0 %v812_v0  ;;  %587 = vmatprep.mubr.msk.f32.mxu0 %vm813_vm0, %v812_v0  ;;  %v228_v2 = vld [vmem:[%s1048_s1] sm:$0x1]  ;;  %vm316_vm3 = vcmask 64512   ;;  %v393_v12 = vld [vmem:[#allocation5 + $0x8] sm:$0xff] }
  0x57   : > { %603 = vmatprep.mubr.msk.f32.mxu1 %vm813_vm0, %v812_v0  ;;  %586 = vmatpush3.xpose.msk.msra.mxu0 %vm229_vm1, %v227_v1  ;;  %v814_v13 = vmov 0.0|0.0   ;;  %v607_v14 = vpack.c.bf16 %v393_v12, %v392_v11  ;;  %v394_v15 = vld [vmem:[#allocation5 + $0x10] sm:$0xff]  ;;  %v395_v16 = vld [vmem:[#allocation5 + $0x18] sm:$0xff]  ;;  %s573_s29 = sshll.u32 %s862_s19, 4  ;;  %s226_s10 = scalar_lea.vmem [#allocation7], %s977_s25 }
  0x58   : > { %590 = vmatprep.subr.mxu0 %v812_v0  ;;  %606 = vmatprep.subr.bf16.mxu1 %v814_v13  ;;  %v610_v17 = vpack.c.bf16 %v395_v16, %v394_v15  ;;  %v396_v23 = vld [vmem:[%s1050_s3] sm:$0x1]  ;;  %s484_s14 = sshll.u32 %s226_s10, 4  ;;  %s1003_s5 = scalar_lea.hbm %s1051_s4, %s573_s29  ;;  %s1005_s14 = int_to_ptr.vmem [resolvable:$true] %s484_s14 }
  0x59   : > { %608 = vmatpush3.bf16.msra.mxu1 %v607_v14  ;;  %s472_s7 = scalar_lea.sflag [#allocation4], %s977_s25  ;;  %s736_s26 = scalar_lea.vmem %s1005_s14, 16 }
  0x5a   : > { %588 = vmatmul.mubr.msk.f32.vlgmr.msra.gmra.mrb[0].mxu0 %vm229_vm1, %v228_v2  ;;  %609 = vmatprep.subr.bf16.mxu1 %v814_v13  ;;  %p737_p4 = scmp.ne.s32.totalorder %s1005_s14, %s736_s26  ;;  %s815_s19 = smov [#allocation7]  }
  0x5b   : > { %591 = vmatpush3.msra.mxu0 %v227_v1  ;;  %592 = vmatprep.mubr.msk.f32.mxu0 %vm813_vm0, %v812_v0  ;;  %s740_s8 = sshll.u32 %s815_s19, 4  ;;  %s741_s8 = int_to_ptr.vmem [resolvable:$false] %s740_s8 }
  0x5c   : > { %p738_p6 = pnand %p737_p4, %p932_p12  ;;  %s742_s11 = scalar_lea.vmem %s741_s8, 32 }
  0x5d   : > { %611 = vmatpush3.bf16.msra.mxu1 %v610_v17  ;;  %p743_p10 = scmp.lt.s32.totalorder %s1005_s14, %s741_s8  ;;  %p744_p13 = scmp.lt.s32.totalorder %s742_s11, %s736_s26 }
  0x5e   : > { %p739_p8 = pneg %p738_p6 }
  0x5f   : > { %p745_p3 = por %p744_p13, %p743_p10 }
  0x61   : > { %p746_p7 = pnand %p745_p3, %p739_p8 }
 0x12d   : > { %v302_v3 = vpop.f32.mrb[0].mxu0 }
 0x12e   : > { %v589_v4 = vpop.f32.mrb[1].mxu0  ;;  %v307_v5 = vsel %vm306_vm2, %v302_v3, -inf }
 0x12f   : > { %308 = vmax.xlane.f32.xlu0 %v307_v5 }
 0x1bc   : > { %v309_v6 = vpop.xlane.xlu0 %308 }
 0x1bd   : > { %v310_v7 = vsub.f32 %v302_v3, %v309_v6 }
 0x1bf   : > { %v311_v8 = vmul.f32 1.442695, %v310_v7 }
 0x1c1   : > { %674 = vpow2.f32 %v311_v8 }
 0x1cb   : > { %v675_v9 = vpop.eup %674 }
 0x1cc   : > { %593 = vmatmul.mubr.msk.f32.vlgmr.msra.gmra.mrb[2].mxu0 %vm316_vm3, %v675_v9  ;;  %v313_v10 = vsel %vm306_vm2, %v675_v9, 0.0 }
 0x1cd   : > { %314 = vadd.xlane.f32.xlu0 %v313_v10 }
 0x25a   : > { %v315_v18 = vpop.xlane.xlu0 %314 }
 0x25b   : > { %676 = vrcp.f32 %v315_v18 }
 0x265   : > { %v677_v19 = vpop.eup %676 }
 0x29f   : > { %v386_v20 = vpop.f32.mrb[2].mxu0 }
 0x2a0   : > { %v391_v21 = vmul.f32 %v677_v19, %v386_v20  ;;  %v594_v22 = vpop.f32.mrb[3].mxu0 }
 0x2a2   : > { %604 = vmatmul.mubr.msk.f32.vlgmr.msra.gmra.mrb[0].mxu1 %vm229_vm1, %v391_v21 }
 0x375   : > { %v466_v24 = vpop.f32.mrb[0].mxu1 }
 0x376   : > { %v467_v25 = vadd.f32 %v466_v24, %v396_v23  ;;  %v605_v26 = vpop.f32.mrb[1].mxu1 }
 0x378   : > { %470 = vst [vmem:[%s226_s10] sm:$0x1] %v467_v25 }
 0x379   : > { %749 = shalt.err (!%p746_p7)
}
 0x37a   : > { %s750_s25 = scalar_lea.hbm %s1003_s5, 16  ;;  %s754_s23 = scalar_lea.hbm %s1051_s4, 32 }
 0x37b   : > { %p751_p9 = scmp.ne.s32.totalorder %s1003_s5, %s750_s25  ;;  %p755_p0 = scmp.lt.u32.totalorder %s1003_s5, %s1051_s4 }
 0x37c   : > { %p756_p1 = scmp.lt.u32.totalorder %s754_s23, %s750_s25  ;;  %p758_p4 = scmp.lt.u32.totalorder %s750_s25, %s1003_s5 }
 0x37d   : > { %p752_p2 = pnand %p751_p9, %p932_p12 }
 0x37e   : > { %p757_p11 = por %p756_p1, %p755_p0 }
 0x37f   : > { %p753_p5 = pneg %p752_p2 }
 0x380   : > { %p759_p6 = por %p758_p4, %p757_p11 }
 0x382   : > { %p760_p8 = pnand %p759_p6, %p753_p5 }
 0x384   : > { %763 = shalt.err (!%p760_p8)
}
 0x385   : > { %618 = dma.vmem_to_hbm [thread:$0]  (%p932_p12), %s1005_s14, 16, %s1003_s5, %s472_s7  }
 0x386 PF: > { %s496_s28 = sand.u32 1, %s794_s15   ;;  %p1066_p10 = scmp.ne.s32.totalorder %s1056_s22, 0 }
 0x387   : > { %p1067_p13 = scmp.ge.s32.totalorder %s806_s18, 2  ;;  %s497_s29 = scalar_lea.sflag [#allocation4], %s496_s28 }
 0x389   : > { %p629_p3 = pnand %p1067_p13, %p1066_p10 }
 0x38b   : > { %789 = dma.done.wait (!%p629_p3), %s497_s29, 16  }
 0x38c   : > { %791 = vsyncadd (!%p629_p3), %s497_s29, 4294967280  ;;  %p18_p7 = scmp.ge.s32.totalorder %s897_s27, 4   ;;  %s1068_s15 = smov %s798_s16 }
 0x38d   : > { %s1069_s16 = smov %s802_s17  ;;  %s1070_s17 = smov %s928_s24 }
 0x38e   : > { %s1071_s18 = smov %s897_s27  ;;  %20 = sbr.rel (!%p18_p7) target bundleno = 6 (0x6), region = 85 }
 0x395   :  { %501 = vsyncpa [#allocation3], 1 }
 0x396   :  { %503 = vsyncpa [#allocation3 + $0x1], 1 }
 0x397   :  { %504 = vsyncpa [#allocation6], 1 }
 0x398   :  { %505 = vsyncpa [#allocation4], 1 }
 0x399   :  { %507 = vsyncpa [#allocation4 + $0x1], 1 }

</bundles_post_ra>
